<compile_context>
chip_gen: v7x
topology: tpu7x:2x2x1
jax: 0.10.0
libtpu: 0.0.40
codegen_flags: <defaults>
</compile_context>

<pallas_src>
import jax
import jax.numpy as jnp
from jax.experimental import pallas as pl
from jax.experimental.pallas import tpu as pltpu


def _make_dma_copy_kernel(chunk_starts, chunk_sizes, whole):
    """Builds a kernel that copies x_ref -> o_ref with direct HBM->HBM DMAs.

    chunk_starts / chunk_sizes are static Python ints splitting the leading
    dimension into concurrent DMA chunks.  whole=True issues one whole-ref DMA
    (small or un-splittable arrays).  Returns (kernel, num_semaphores).
    """
    n = 1 if whole else len(chunk_starts)

    def kernel(x_ref, o_ref, sems):
        if whole:
            cp = pltpu.make_async_copy(x_ref, o_ref, sems.at[0])
            cp.start()
            cp.wait()
            return
        copies = []
        for c in range(n):  # static unroll: start all DMAs, then wait all
            s = chunk_starts[c]
            sz = chunk_sizes[c]
            cp = pltpu.make_async_copy(
                x_ref.at[pl.ds(s, sz)],
                o_ref.at[pl.ds(s, sz)],
                sems.at[c],
            )
            cp.start()
            copies.append(cp)
        for cp in copies:
            cp.wait()

    return kernel, n


def neuron_function_list_forward(x, *, materialize=True):
    """Pallas equivalent of NeuronFunctionList.forward.

    x: [layer, activation, ...] array.  Returns a freshly materialized copy
    (the semantics of torch.stack over the unbound layer slices).  With
    materialize=False the copy is elided (functionally indistinguishable in JAX).
    """
    if not materialize:
        return x  # copy elision: zero HBM traffic

    n_elems = 1
    for d in x.shape:
        n_elems *= int(d)
    if n_elems == 0:
        return x  # nothing to copy; avoid zero-sized blocks in Mosaic

    itemsize = jnp.dtype(x.dtype).itemsize
    n_bytes = n_elems * itemsize

    # Split the leading dim into up to 8 concurrent DMA chunks for larger
    # arrays (keeps multiple DMA engines busy); tiny arrays use one DMA.
    if x.ndim == 0 or int(x.shape[0]) < 2 or n_bytes < (64 << 10):
        whole = True
        starts, sizes = (), ()
    else:
        whole = False
        dim0 = int(x.shape[0])
        k = min(8, dim0)
        base, rem = divmod(dim0, k)
        sizes = tuple(base + (1 if i < rem else 0) for i in range(k))
        starts = []
        acc = 0
        for s in sizes:
            starts.append(acc)
            acc += s
        starts = tuple(starts)

    kernel, n_sems = _make_dma_copy_kernel(starts, sizes, whole)

    return pl.pallas_call(
        kernel,
        out_shape=jax.ShapeDtypeStruct(x.shape, x.dtype),
        in_specs=[pl.BlockSpec(memory_space=pl.ANY)],   # raw HBM ref, no auto-DMA
        out_specs=pl.BlockSpec(memory_space=pl.ANY),    # raw HBM ref, DMA'd into
        scratch_shapes=[pltpu.SemaphoreType.DMA((n_sems,))],
        cost_estimate=pl.CostEstimate(
            flops=0, transcendentals=0, bytes_accessed=2 * n_bytes),
    )(x)


# The stored neuron-mask submodules never participate in forward(); we only
# mirror their existence so the module shape is represented.
# TODO(synk): __getitem__ exposes individual mask modules; that is host-side
# Python indexing with no kernel equivalent.
def make_placeholder_masks(num_layers, hidden, dtype=jnp.float32):
    return [jnp.ones((hidden,), dtype=dtype) for _ in range(num_layers)]


if __name__ == "__main__":
    key = jax.random.PRNGKey(0)

    # [layer, activation(batch), hidden] — small shape, single-DMA path.
    L, B, D = 4, 8, 32
    x = jax.random.normal(key, (L, B, D), dtype=jnp.float32)
    _ = make_placeholder_masks(L, D)  # parameters exist but are unused in forward

    y = jax.block_until_ready(neuron_function_list_forward(x))
    assert y.shape == x.shape and y.dtype == x.dtype
    assert bool(jnp.all(y == x))

    # Slightly larger -> exercises the chunked concurrent-DMA path (k=8).
    x_big = jax.random.normal(jax.random.PRNGKey(1), (8, 32, 128), dtype=jnp.float32)
    y_big = jax.block_until_ready(neuron_function_list_forward(x_big))
    assert y_big.shape == x_big.shape and bool(jnp.all(y_big == x_big))

    # Irregular shape -> no (8,128) constraint with raw-HBM DMA, no fallback needed.
    x_odd = jax.random.normal(jax.random.PRNGKey(2), (3, 5, 7), dtype=jnp.float32)
    y_odd = jax.block_until_ready(neuron_function_list_forward(x_odd))
    assert y_odd.shape == x_odd.shape and bool(jnp.all(y_odd == x_odd))

    # bf16 path (different element size, same DMA copy).
    x_bf = jax.random.normal(jax.random.PRNGKey(3), (4, 16, 64)).astype(jnp.bfloat16)
    y_bf = jax.block_until_ready(neuron_function_list_forward(x_bf))
    assert y_bf.shape == x_bf.shape and y_bf.dtype == x_bf.dtype
    assert bool(jnp.all(y_bf == x_bf))

    # Copy-elision path (zero traffic) is trivially identical.
    assert neuron_function_list_forward(x, materialize=False) is x

    print("KERNEL_OK")
</pallas_src>

<mosaic_0001>
module attributes {stable_mosaic.version = 11 : i64} {
  func.func @kernel(%arg0: memref<4x8x32xf32, #tpu.memory_space<any>>, %arg1: memref<4x8x32xf32, #tpu.memory_space<any>>, %arg2: memref<1x!tpu.dma_semaphore, #tpu.memory_space<semaphore_mem>>) attributes {dimension_semantics = [], scalar_prefetch = 0 : i64, scratch_operands = 1 : i64, tpu.core_type = #tpu.core_type<tc>} {
    %c0_i32 = arith.constant 0 : i32
    %0 = tpu.memref_slice %arg2[%c0_i32] : memref<1x!tpu.dma_semaphore, #tpu.memory_space<semaphore_mem>> -> memref<1x!tpu.dma_semaphore, #tpu.memory_space<semaphore_mem>>
    %1 = tpu.memref_squeeze %0 : memref<1x!tpu.dma_semaphore, #tpu.memory_space<semaphore_mem>> -> memref<!tpu.dma_semaphore, #tpu.memory_space<semaphore_mem>>
    tpu.enqueue_dma source(%arg0 : memref<4x8x32xf32, #tpu.memory_space<any>>) target(%arg1 : memref<4x8x32xf32, #tpu.memory_space<any>>) target_semaphore(%1 : memref<!tpu.dma_semaphore, #tpu.memory_space<semaphore_mem>>)
    %c0_i32_0 = arith.constant 0 : i32
    %2 = tpu.memref_slice %arg2[%c0_i32_0] : memref<1x!tpu.dma_semaphore, #tpu.memory_space<semaphore_mem>> -> memref<1x!tpu.dma_semaphore, #tpu.memory_space<semaphore_mem>>
    %3 = tpu.memref_squeeze %2 : memref<1x!tpu.dma_semaphore, #tpu.memory_space<semaphore_mem>> -> memref<!tpu.dma_semaphore, #tpu.memory_space<semaphore_mem>>
    tpu.wait_dma2 semaphore(%3 : memref<!tpu.dma_semaphore, #tpu.memory_space<semaphore_mem>>) src(%arg0 : memref<4x8x32xf32, #tpu.memory_space<any>>) dst(%arg1 : memref<4x8x32xf32, #tpu.memory_space<any>>)
    return
  }
}

</mosaic_0001>

<bundles_post_ra>
// kernel: tpu_custom_call.1
= control target key start
LH: loop header
LB: loop body
LE: loop exit
PB: predicated region body
PF: predicated region fallthrough
CT: control target
= control target key end

     0   :  { %s35_s6 = smov [#allocation2]   ;;  %s36_s7 = smov [#allocation3]   ;;  %s54_s0 = inlined_call_operand.hbm [shape: f32[4,8,32], index: 0, kind: input, shape index: {}]   ;;  %s55_s1 = inlined_call_operand.hbm [shape: f32[4,8,32], index: 1, kind: output, shape index: {}]  }
   0x1   :  { %s37_s8 = smov 0  }
   0x2   :  { %18 = dma.general %s54_s0, 512, %s55_s1, %s35_s6, %s36_s7, [#allocation4], %s37_s8, 0  }
   0x3   :  { %33 = dma.done.wait [#allocation2], 512 }
   0x4   :  { %34 = vsyncadd [#allocation2], 4294966784 }
   0x5   :  { %23 = vsyncmov [#allocation2] }
   0x8   :  { %s24_s13 = vpop.sfrf %23 }
   0x9   :  { %p29_p0 = scmp.ne.s32.totalorder %s24_s13, 0 }
   0xb   :  { %28 = shalt.err (%p29_p0)  }

</bundles_post_ra>
